<compile_context>
chip_gen: v7x
topology: tpu7x:2x2x1
jax: 0.10.0
libtpu: 0.0.40
codegen_flags: <defaults>
</compile_context>

<pallas_src>
import functools

import numpy as np
import jax
import jax.numpy as jnp
from jax.experimental import pallas as pl
from jax.experimental.pallas import tpu as pltpu

_DEFAULT_VMEM = 64 * 1024 * 1024  # conservative (v7x per-TC) fallback


def _tpu_vmem_and_cores():
    """(per-core VMEM bytes, tensorcores per chip) with safe fallbacks."""
    vmem = _DEFAULT_VMEM
    cores = 1
    try:
        info = pltpu.get_tpu_info()
        for name in ("vmem_capacity_bytes", "vmem_size_bytes", "vmem_bytes"):
            v = getattr(info, name, None)
            if v:
                vmem = int(v)
                break
        c = getattr(info, "num_cores", None) or getattr(info, "tensor_cores_per_chip", None)
        if c:
            cores = int(c)
        else:
            # heuristic: 64 MiB per-TC VMEM => v7x-style 2-TC chip
            cores = 2 if vmem <= 64 * 1024 * 1024 else 1
    except Exception:
        pass
    return vmem, cores


def _bilinear_weight_matrix(out_size: int, in_size: int) -> jnp.ndarray:
    """Row-stochastic (out_size, in_size) bilinear resampling matrix (f32)."""
    scale = in_size / out_size
    dst = np.arange(out_size, dtype=np.float64)
    src = np.clip((dst + 0.5) * scale - 0.5, 0.0, float(in_size - 1))
    i0 = np.floor(src).astype(np.int64)
    i1 = np.minimum(i0 + 1, in_size - 1)
    w1 = (src - i0).astype(np.float32)
    w0 = (1.0 - w1).astype(np.float32)
    w = np.zeros((out_size, in_size), dtype=np.float32)
    rows = np.arange(out_size)
    w[rows, i0] += w0
    w[rows, i1] += w1
    return jnp.asarray(w)


def _largest_divisor_le(n: int, cap: int) -> int:
    """Largest divisor of n that is <= cap (>= 1). Avoids any pad/slice pass."""
    cap = max(1, min(cap, n))
    for b in range(cap, 0, -1):
        if n % b == 0:
            return b
    return 1


def _resize_kernel(x_ref, wht_ref, wwt_ref, o_ref, *, h_first: bool, flat_out: bool):
    # x_ref:   (bsz, H_in, W_in)    original dtype
    # wht_ref: (H_in, H_out)        f32   (Wh^T)
    # wwt_ref: (W_in, W_out)        f32   (Ww^T)
    # o_ref:   (bsz*H_out, W_out)  or (bsz, H_out, W_out)   original dtype
    bsz, h_in, w_in = x_ref.shape
    h_out = wht_ref.shape[1]
    w_out = wwt_ref.shape[1]

    x = x_ref[...].astype(jnp.float32)  # f32 compute: taps sum exactly to 1
    wht = wht_ref[...]
    wwt = wwt_ref[...]

    if h_first:
        # H contraction as ONE big matmul: (B*W_in, H_in) @ (H_in, H_out)
        t = jnp.dot(jnp.swapaxes(x, 1, 2).reshape(bsz * w_in, h_in), wht,
                    preferred_element_type=jnp.float32)            # (B*W_in, H_out)
        t = jnp.swapaxes(t.reshape(bsz, w_in, h_out), 1, 2)        # (B, H_out, W_in)
        out = jnp.dot(t.reshape(bsz * h_out, w_in), wwt,
                      preferred_element_type=jnp.float32)          # (B*H_out, W_out)
    else:
        # W contraction first: (B*H_in, W_in) @ (W_in, W_out)
        t = jnp.dot(x.reshape(bsz * h_in, w_in), wwt,
                    preferred_element_type=jnp.float32)            # (B*H_in, W_out)
        t = jnp.swapaxes(t.reshape(bsz, h_in, w_out), 1, 2)        # (B, W_out, H_in)
        out = jnp.dot(t.reshape(bsz * w_out, h_in), wht,
                      preferred_element_type=jnp.float32)          # (B*W_out, H_out)
        out = jnp.swapaxes(out.reshape(bsz, w_out, h_out), 1, 2)
        out = out.reshape(bsz * h_out, w_out)

    if jnp.issubdtype(o_ref.dtype, jnp.integer):
        info = jnp.iinfo(o_ref.dtype)
        out = jnp.clip(jnp.round(out), info.min, info.max)
    if not flat_out:
        out = out.reshape(bsz, h_out, w_out)
    o_ref[...] = out.astype(o_ref.dtype)


def _resize_planes(planes, size):
    """Resize a stack of (NC, H_in, W_in) planes to (NC, H_out, W_out)."""
    nc, h_in, w_in = planes.shape
    h_out, w_out = size
    dtype = planes.dtype
    in_bytes = dtype.itemsize

    wht = _bilinear_weight_matrix(h_out, h_in).T  # (H_in, H_out) f32
    wwt = _bilinear_weight_matrix(w_out, w_in).T  # (W_in, W_out) f32

    # Contraction order: smaller intermediate first (kernel is HBM/VMEM-bound
    # for realistic shapes); FLOPs as tie-break.
    inter_h_first = h_out * w_in
    inter_w_first = h_in * w_out
    flops_h_first = h_out * h_in * w_in + h_out * w_in * w_out
    flops_w_first = h_in * w_in * w_out + h_out * h_in * w_out
    if inter_h_first != inter_w_first:
        h_first = inter_h_first < inter_w_first
    else:
        h_first = flops_h_first <= flops_w_first
    inter = inter_h_first if h_first else inter_w_first

    # ---- generation-aware plane-batch sizing -------------------------------
    vmem, cores = _tpu_vmem_and_cores()
    vmem_limit = max(min(vmem * 3 // 4, vmem - (16 << 20)), 32 << 20)
    budget = vmem // 2
    f32 = 4
    per_plane = (
        2 * h_in * w_in * in_bytes          # double-buffered input block
        + 2 * h_out * w_out * in_bytes      # double-buffered output block
        + 2 * f32 * h_in * w_in             # f32 copy of x + transposed relayout
        + 2 * f32 * inter                   # f32 intermediate + transposed relayout
        + 2 * f32 * h_out * w_out           # f32 result before cast (+ slack)
    )
    fixed = 4 * f32 * (h_in * h_out + w_in * w_out) + (2 << 20)  # weight bufs + scratch
    cap = max(1, (budget - fixed) // max(per_plane, 1))
    if cores > 1 and nc >= 2 * cores:
        # keep >= 2 steps per TensorCore so megacore sharding still overlaps
        cap = min(cap, nc // (2 * cores))
    bsz = _largest_divisor_le(nc, int(cap))
    grid = nc // bsz

    # Output stored as the matmul's natural 2-D (bsz*H_out, W_out) block when
    # the BlockSpec (8,·) rule allows; otherwise fall back to a 3-D block.
    flat_out = (grid == 1) or ((bsz * h_out) % 8 == 0)
    if flat_out:
        out_shape = jax.ShapeDtypeStruct((nc * h_out, w_out), dtype)
        out_spec = pl.BlockSpec((bsz * h_out, w_out), lambda b: (b, 0))
    else:
        out_shape = jax.ShapeDtypeStruct((nc, h_out, w_out), dtype)
        out_spec = pl.BlockSpec((bsz, h_out, w_out), lambda b: (b, 0, 0))

    cost = pl.CostEstimate(
        flops=2 * nc * (flops_h_first if h_first else flops_w_first),
        transcendentals=0,
        bytes_accessed=nc * (h_in * w_in + h_out * w_out) * in_bytes
        + 4 * (h_in * h_out + w_in * w_out),
    )

    out = pl.pallas_call(
        functools.partial(_resize_kernel, h_first=h_first, flat_out=flat_out),
        out_shape=out_shape,
        grid_spec=pltpu.PrefetchScalarGridSpec(
            num_scalar_prefetch=0,
            grid=(grid,),
            in_specs=[
                pl.BlockSpec((bsz, h_in, w_in), lambda b: (b, 0, 0)),
                pl.BlockSpec((h_in, h_out), lambda b: (0, 0)),
                pl.BlockSpec((w_in, w_out), lambda b: (0, 0)),
            ],
            out_specs=out_spec,
        ),
        compiler_params=pltpu.CompilerParams(
            dimension_semantics=("parallel",),
            vmem_limit_bytes=int(vmem_limit),
        ),
        cost_estimate=cost,
    )(planes, wht, wwt)

    if flat_out:
        out = out.reshape(nc, h_out, w_out)   # free metadata reshape
    return out


@functools.partial(jax.jit, static_argnames=("size",))
def pallas_resize(x: jnp.ndarray, size) -> jnp.ndarray:
    """Bilinear-resize an NCHW tensor to `size` = (H_out, W_out)."""
    n, c, h_in, w_in = x.shape
    h_out, w_out = size
    out = _resize_planes(x.reshape(n * c, h_in, w_in), (h_out, w_out))
    return out.reshape(n, c, h_out, w_out)


class PairResize:
    """JAX/Pallas port of mixofshow PairResize: resizes img and kwargs['mask']."""

    def __init__(self, size):
        # TODO(synk): torchvision Resize(int) resizes the smaller edge keeping
        # aspect ratio; here an int size is treated as a square target.
        if isinstance(size, int):
            size = (size, size)
        self.size = tuple(int(s) for s in size)

    def __call__(self, img, **kwargs):
        kwargs = dict(kwargs)
        # img and mask are resized by two separate pallas_calls: no concat /
        # pad / output-slice HBM passes.  The extra kernel launch is ~us,
        # negligible vs the removed full passes over the data.
        # TODO(synk): a single pallas_call with two (in, out) ref pairs could
        # save one launch; skipped since both arrays have different NC extents.
        kwargs["mask"] = pallas_resize(kwargs["mask"], self.size)
        return pallas_resize(img, self.size), kwargs


def _reference_resize(x, size):
    """Pure-JAX f32 reference: same separable bilinear resize via einsum."""
    h_out, w_out = size
    h_in, w_in = x.shape[2], x.shape[3]
    wh = _bilinear_weight_matrix(h_out, h_in)
    ww = _bilinear_weight_matrix(w_out, w_in)
    return jnp.einsum("oh,nchw,pw->ncop", wh, x.astype(jnp.float32), ww).astype(x.dtype)


if __name__ == "__main__":
    key = jax.random.PRNGKey(0)
    k_img, k_mask, k_wf = jax.random.split(key, 3)

    img = jax.random.normal(k_img, (2, 4, 16, 16), dtype=jnp.float32)
    mask = jax.random.uniform(k_mask, (2, 1, 16, 16), dtype=jnp.float32)

    transform = PairResize(size=(8, 8))
    out_img, out_kwargs = transform(img, mask=mask)
    jax.block_until_ready(out_img)
    jax.block_until_ready(out_kwargs["mask"])

    # correctness vs pure-JAX reference (MXU default precision => loose tol)
    ref_img = _reference_resize(img, (8, 8))
    ref_mask = _reference_resize(mask, (8, 8))
    assert out_img.shape == (2, 4, 8, 8)
    assert out_kwargs["mask"].shape == (2, 1, 8, 8)
    assert jnp.allclose(out_img, ref_img, atol=1e-1), "img mismatch"
    assert jnp.allclose(out_kwargs["mask"], ref_mask, atol=1e-1), "mask mismatch"

    # also exercise the W-first contraction order (wide input, upscaled H)
    x2 = jax.random.normal(k_wf, (1, 2, 8, 32), dtype=jnp.float32)
    out2 = pallas_resize(x2, (16, 16))
    jax.block_until_ready(out2)
    ref2 = _reference_resize(x2, (16, 16))
    assert out2.shape == (1, 2, 16, 16)
    assert jnp.allclose(out2, ref2, atol=1e-1), "w-first mismatch"

    print("KERNEL_OK")
</pallas_src>

<mosaic_0001>
module attributes {stable_mosaic.version = 11 : i64} {
  func.func @_resize_kernel(%arg0: i32, %arg1: memref<2x16x16xf32, #tpu.memory_space<vmem>>, %arg2: memref<16x8xf32, #tpu.memory_space<vmem>>, %arg3: memref<16x8xf32, #tpu.memory_space<vmem>>, %arg4: memref<16x8xf32, #tpu.memory_space<vmem>>) attributes {dimension_semantics = [#tpu.dimension_semantics<parallel>], iteration_bounds = array<i64: 1>, scalar_prefetch = 0 : i64, scratch_operands = 0 : i64, tpu.core_type = #tpu.core_type<tc>, window_params = [{transform_indices = @transform_0, window_bounds = array<i64: 2, 16, 16>}, {pipeline_mode = #tpu.pipeline_mode<synchronous>, transform_indices = @transform_1, window_bounds = array<i64: 16, 8>}, {pipeline_mode = #tpu.pipeline_mode<synchronous>, transform_indices = @transform_2, window_bounds = array<i64: 16, 8>}, {transform_indices = @transform_3, window_bounds = array<i64: 16, 8>}]} {
    %c0 = arith.constant 0 : index
    %c0_0 = arith.constant 0 : index
    %c0_1 = arith.constant 0 : index
    %0 = vector.load %arg1[%c0, %c0_0, %c0_1] : memref<2x16x16xf32, #tpu.memory_space<vmem>>, vector<2x16x16xf32>
    %c0_2 = arith.constant 0 : index
    %c0_3 = arith.constant 0 : index
    %1 = vector.load %arg2[%c0_2, %c0_3] : memref<16x8xf32, #tpu.memory_space<vmem>>, vector<16x8xf32>
    %c0_4 = arith.constant 0 : index
    %c0_5 = arith.constant 0 : index
    %2 = vector.load %arg3[%c0_4, %c0_5] : memref<16x8xf32, #tpu.memory_space<vmem>>, vector<16x8xf32>
    %3 = tpu.transpose %0, [0, 2, 1] : vector<2x16x16xf32> -> vector<2x16x16xf32>
    %4 = vector.shape_cast %3 : vector<2x16x16xf32> to vector<32x16xf32>
    %cst = arith.constant dense<0.000000e+00> : vector<32x8xf32>
    %5 = tpu.matmul %4, %1, %cst {dimension_numbers = #tpu.dot_dimension_numbers<[1], [0], [0], [1], [0, 0, 1, 1], [], []>} : vector<32x16xf32>, vector<16x8xf32>, vector<32x8xf32> -> vector<32x8xf32>
    %6 = vector.shape_cast %5 : vector<32x8xf32> to vector<2x16x8xf32>
    %7 = tpu.transpose %6, [0, 2, 1] : vector<2x16x8xf32> -> vector<2x8x16xf32>
    %8 = vector.shape_cast %7 : vector<2x8x16xf32> to vector<16x16xf32>
    %cst_6 = arith.constant dense<0.000000e+00> : vector<16x8xf32>
    %9 = tpu.matmul %8, %2, %cst_6 {dimension_numbers = #tpu.dot_dimension_numbers<[1], [0], [0], [1], [0, 0, 1, 1], [], []>} : vector<16x16xf32>, vector<16x8xf32>, vector<16x8xf32> -> vector<16x8xf32>
    %c0_7 = arith.constant 0 : index
    %c0_8 = arith.constant 0 : index
    %10 = vector.load %arg4[%c0_7, %c0_8] : memref<16x8xf32, #tpu.memory_space<vmem>>, vector<16x8xf32>
    tpu.vector_store %arg4[%c0_7, %c0_8], %9 {strides = array<i32>} : memref<16x8xf32, #tpu.memory_space<vmem>>, vector<16x8xf32>,
    return
  }
  func.func @transform_0(%arg0: i32) -> (i32, i32, i32) {
    %c0_i32 = arith.constant 0 : i32
    %c0_i32_0 = arith.constant 0 : i32
    %c0_i32_1 = arith.constant 0 : i32
    return %arg0, %c0_i32, %c0_i32_0 : i32, i32, i32
  }
  func.func @transform_1(%arg0: i32) -> (i32, i32) {
    %c0_i32 = arith.constant 0 : i32
    %c0_i32_0 = arith.constant 0 : i32
    %c0_i32_1 = arith.constant 0 : i32
    return %c0_i32, %c0_i32_0 : i32, i32
  }
  func.func @transform_2(%arg0: i32) -> (i32, i32) {
    %c0_i32 = arith.constant 0 : i32
    %c0_i32_0 = arith.constant 0 : i32
    %c0_i32_1 = arith.constant 0 : i32
    return %c0_i32, %c0_i32_0 : i32, i32
  }
  func.func @transform_3(%arg0: i32) -> (i32, i32) {
    %c0_i32 = arith.constant 0 : i32
    %c0_i32_0 = arith.constant 0 : i32
    return %arg0, %c0_i32 : i32, i32
  }
}

</mosaic_0001>

<bundles_post_ra>
// kernel: pallas_resize.1
= control target key start
LH: loop header
LB: loop body
LE: loop exit
PB: predicated region body
PF: predicated region fallthrough
CT: control target
= control target key end

     0   :  { %8 = vsyncpa [#allocation3], 0  ;;  %s633_s0 = inlined_call_operand.hbm [shape: f32[2,16,16], index: 0, kind: input, shape index: {}]   ;;  %s634_s1 = inlined_call_operand.hbm [shape: f32[16,8], index: 1, kind: input, shape index: {}, may-alias: {1,2}]   ;;  %s635_s2 = inlined_call_operand.hbm [shape: f32[16,8], index: 2, kind: input, shape index: {}, may-alias: {1,2}]   ;;  %s636_s3 = inlined_call_operand.hbm [shape: f32[16,8], index: 3, kind: output, shape index: {}]  }
   0x1   :  { %9 = vsyncpa [#allocation6], 0 }
   0x2   :  { %10 = vsyncpa [#allocation4], 0  ;;  %s534_s12 = smov [#allocation5]   ;;  %s535_s14 = smov [#allocation2]  }
   0x3   :  { %s28_s13 = sshll.u32 %s534_s12, 4  ;;  %s16_s15 = sshll.u32 %s535_s14, 4  ;;  %s29_s13 = int_to_ptr.vmem [resolvable:$true] %s28_s13  ;;  %s560_s15 = int_to_ptr.vmem [resolvable:$true] %s16_s15 }
   0x4   :  { %s440_s18 = scalar_lea.hbm %s634_s1, 256 }
   0x5   :  { %p441_p0 = scmp.ne.s32.totalorder %s634_s1, %s440_s18  ;;  %p444_p1 = scmp.lt.u32.totalorder %s440_s18, %s634_s1 }
   0x7   :  { %p446_p2 = pnand %p444_p1, %p441_p0 }
   0x9   :  { %449 = shalt.err (!%p446_p2)
}
   0xa   :  { %s450_s23 = scalar_lea.vmem %s29_s13, 256  ;;  %p455_p4 = scmp.lt.s32.totalorder %s29_s13, %s29_s13 }
   0xb   :  { %p451_p3 = scmp.ne.s32.totalorder %s29_s13, %s450_s23  ;;  %p456_p5 = scmp.lt.s32.totalorder %s450_s23, %s450_s23 }
   0xd   :  { %p457_p6 = por %p456_p5, %p455_p4 }
   0xf   :  { %p458_p7 = pnand %p457_p6, %p451_p3 }
  0x11   :  { %461 = shalt.err (!%p458_p7)
}
  0x12   :  { %s536_s24 = smov 128   ;;  %s537_s25 = smov 8  }
  0x13   :  { %34 = dma.hbm_to_vmem [thread:$0]  %s634_s1, 256, %s29_s13, [#allocation6], %s536_s24, %s536_s24, %s537_s25  }
  0x14   :  { %s462_s30 = scalar_lea.hbm %s633_s0, 512 }
  0x15   :  { %p463_p8 = scmp.ne.s32.totalorder %s633_s0, %s462_s30  ;;  %p466_p9 = scmp.lt.u32.totalorder %s462_s30, %s633_s0 }
  0x17   :  { %p468_p10 = pnand %p466_p9, %p463_p8 }
  0x19   :  { %471 = shalt.err (!%p468_p10)
}
  0x1a   :  { %s472_s8 = scalar_lea.vmem %s560_s15, 512  ;;  %p477_p12 = scmp.lt.s32.totalorder %s560_s15, %s560_s15 }
  0x1b   :  { %p473_p11 = scmp.ne.s32.totalorder %s560_s15, %s472_s8  ;;  %p478_p13 = scmp.lt.s32.totalorder %s472_s8, %s472_s8 }
  0x1d   :  { %p479_p0 = por %p478_p13, %p477_p12 }
  0x1f   :  { %p480_p1 = pnand %p479_p0, %p473_p11 }
  0x21   :  { %483 = shalt.err (!%p480_p1)
}
  0x22   :  { %22 = dma.hbm_to_vmem [thread:$0]  %s633_s0, 512, %s560_s15, [#allocation3], %s536_s24, %s536_s24, %s537_s25  }
  0x23   :  { %s538_s10 = smov [#allocation7]   ;;  %s484_s14 = scalar_lea.hbm %s635_s2, 256 }
  0x24   :  { %s40_s11 = sshll.u32 %s538_s10, 4  ;;  %p485_p2 = scmp.ne.s32.totalorder %s635_s2, %s484_s14  ;;  %s41_s11 = int_to_ptr.vmem [resolvable:$true] %s40_s11 }
  0x25   :  { %p488_p3 = scmp.lt.u32.totalorder %s484_s14, %s635_s2 }
  0x27   :  { %p490_p4 = pnand %p488_p3, %p485_p2 }
  0x29   :  { %493 = shalt.err (!%p490_p4)
}
  0x2a   :  { %s494_s20 = scalar_lea.vmem %s41_s11, 256  ;;  %p499_p6 = scmp.lt.s32.totalorder %s41_s11, %s41_s11 }
  0x2b   :  { %p495_p5 = scmp.ne.s32.totalorder %s41_s11, %s494_s20  ;;  %p500_p7 = scmp.lt.s32.totalorder %s494_s20, %s494_s20 }
  0x2d   :  { %p501_p8 = por %p500_p7, %p499_p6 }
  0x2f   :  { %p502_p9 = pnand %p501_p8, %p495_p5 }
  0x31   :  { %505 = shalt.err (!%p502_p9)
}
  0x32   :  { %46 = dma.hbm_to_vmem [thread:$0]  %s635_s2, 256, %s41_s11, [#allocation6], %s536_s24, %s536_s24, %s537_s25  }
  0x33   :  { %528 = dma.done.wait [#allocation3], 512  }
  0x34   :  { %529 = vsyncadd [#allocation3], 4294966784 }
  0x35   :  { %530 = dma.done.wait [#allocation6], 512  }
  0x36   :  { %531 = vsyncadd [#allocation6], 4294966784  ;;  %v56_v0 = vld [vmem:[#allocation2] sm:$0xff]  ;;  %v58_v1 = vld [vmem:[#allocation2 + $0x10] sm:$0xff]  ;;  %vm128_vm0 = vcmask 130048   ;;  %s539_s2 = smov [#allocation8]  }
  0x37   :  { %64 = vxpose.xlu0.b32.start [1/2] (short) (narrow) %v56_v0, 16  ;;  %96 = vxpose.xlu1.b32.start [1/2] (short) (narrow) %v58_v1, 16  ;;  %v60_v2 = vld [vmem:[#allocation5] sm:$0xff]  ;;  %v61_v3 = vld [vmem:[#allocation5 + $0x8] sm:$0xff]  ;;  %v59_v5 = vld [vmem:[#allocation2 + $0x18] sm:$0xff]  ;;  %s379_s21 = sshll.u32 %s539_s2, 4  ;;  %s380_s21 = int_to_ptr.vmem [resolvable:$true] %s379_s21 }
  0x38   :  { %v57_v4 = vld [vmem:[#allocation2 + $0x8] sm:$0xff]  ;;  %v425_v6 = vpack.c.bf16 %v61_v3, %v60_v2  ;;  %v62_v11 = vld [vmem:[#allocation7] sm:$0xff]  ;;  %v63_v12 = vld [vmem:[#allocation7 + $0x8] sm:$0xff]  ;;  %vm371_vm1 = vcmask 64512   ;;  %s506_s22 = scalar_lea.vmem %s380_s21, 256  ;;  %p511_p11 = scmp.lt.s32.totalorder %s380_s21, %s380_s21 }
  0x39   :  { %v429_v13 = vpack.c.bf16 %v63_v12, %v62_v11  ;;  %p507_p10 = scmp.ne.s32.totalorder %s380_s21, %s506_s22  ;;  %p512_p12 = scmp.lt.s32.totalorder %s506_s22, %s506_s22 }
  0x3a   :  { %426 = vmatprep.subr.bf16.mxu0 %v425_v6 }
  0x3b   :  { %65 = vxpose.xlu0.b32.end [2/2] (short) (narrow) %v57_v4, 16  ;;  %97 = vxpose.xlu1.b32.end [2/2] (short) (narrow) %v59_v5, 16  ;;  %p513_p13 = por %p512_p12, %p511_p11 }
  0x3c   :  { %428 = vmatpush3.bf16.msra.mxu0 %v425_v6  ;;  %430 = vmatprep.subr.bf16.mxu1 %v429_v13 }
  0x3d   :  { %432 = vmatpush3.bf16.msra.mxu1 %v429_v13  ;;  %p514_p0 = pnand %p513_p13, %p507_p10 }
  0xb7   :  { %v80_v7 = vpop.trf.xlu0  ;;  %v112_v8 = vpop.trf.xlu1 }
  0xb8   :  { %412 = vmatprep.mubr.msk.f32.mxu0 %vm128_vm0, %v80_v7 }
  0xbb   :  { %v81_v9 = vpop.trf.xlu0  ;;  %v113_v10 = vpop.trf.xlu1 }
  0xbc   :  { %413 = vmatmul.mubr.msk.f32.vlgmr.msra.gmra.mrb[0].mxu0 %vm128_vm0, %v81_v9 }
  0xbd   :  { %415 = vmatprep.mubr.msk.f32.mxu0 %vm128_vm0, %v112_v8 }
  0xc0   :  { %416 = vmatmul.mubr.msk.f32.gmra.mrb[2].mxu0 %vm128_vm0, %v113_v10 }
 0x18f   :  { %v414_v14 = vpop.f32.mrb[0].mxu0 }
 0x190   :  { %v207_v15 = vpop.f32.mrb[1].mxu0 }
 0x191   :  { %226 = vxpose.xlu0.b32.start [1/2] (short) (narrow) %v207_v15, 8 }
 0x193   :  { %v417_v16 = vpop.f32.mrb[2].mxu0 }
 0x194   :  { %v217_v17 = vpop.f32.mrb[3].mxu0 }
 0x195   :  { %227 = vxpose.xlu0.b32.end [2/2] (short) (narrow) %v414_v14, 8  ;;  %258 = vxpose.xlu1.b32.start [1/2] (short) (narrow) %v217_v17, 8 }
 0x199   :  { %259 = vxpose.xlu1.b32.end [2/2] (short) (narrow) %v417_v16, 8 }
 0x211   :  { %v242_v18 = vpop.trf.xlu0 }
 0x212   :  { %422 = vmatprep.mubr.msk.f32.mxu1 %vm128_vm0, %v242_v18 }
 0x215   :  { %v274_v19 = vpop.trf.xlu1 }
 0x216   :  { %423 = vmatmul.mubr.msk.f32.vlgmr.msra.gmra.mrb[0].mxu1 %vm128_vm0, %v274_v19 }
 0x2e9   :  { %v424_v20 = vpop.f32.mrb[0].mxu1 }
 0x2ea   :  { %373 = vst.msk [vmem:[#allocation8 + $0x8] sm:$0xff] %vm371_vm1, %v424_v20  ;;  %v362_v21 = vpop.f32.mrb[1].mxu1 }
 0x2eb   :  { %372 = vst.msk [vmem:[#allocation8] sm:$0xff] %vm371_vm1, %v362_v21 }
 0x2ec   :  { %517 = shalt.err (!%p514_p0)
}
 0x2ed   :  { %s518_s27 = scalar_lea.hbm %s636_s3, 256 }
 0x2ee   :  { %p519_p1 = scmp.ne.s32.totalorder %s636_s3, %s518_s27  ;;  %p522_p2 = scmp.lt.u32.totalorder %s518_s27, %s636_s3 }
 0x2f0   :  { %p524_p3 = pnand %p522_p2, %p519_p1 }
 0x2f2   :  { %527 = shalt.err (!%p524_p3)
}
 0x2f3   :  { %385 = dma.vmem_to_hbm [thread:$0]  %s380_s21, 256, %s636_s3, [#allocation4], %s536_s24, %s536_s24, %s537_s25  }
 0x2f4   :  { %532 = dma.done.wait [#allocation4], 256  }
 0x2f5   :  { %533 = vsyncadd [#allocation4], 4294967040 }
 0x2f6   :  { %389 = vsyncpa [#allocation3], 1 }
 0x2f7   :  { %390 = vsyncpa [#allocation6], 1 }
 0x2f8   :  { %391 = vsyncpa [#allocation4], 1 }

</bundles_post_ra>
